<compile_context>
chip_gen: v7x
topology: tpu7x:2x2x1
jax: 0.10.0
libtpu: 0.0.40
codegen_flags: <defaults>
</compile_context>

<pallas_src>
import jax
import jax.numpy as jnp
from jax.experimental import pallas as pl
from jax.experimental.pallas import tpu as pltpu

IN_FEATURES = 512
HIDDEN = 128
OUT_FEATURES = 1
BN_EPS = 1e-5


def _round_up(n, m):
    return (n + m - 1) // m * m


def _make_kernel(tb, num_tiles, n_valid):
    inv_n = 1.0 / float(n_valid)

    def kernel(x_ref, w1_ref, gamma_ref, beta_ref, w2_ref, b2_ref,
               o_ref, h_scratch, sum_scratch, sq_scratch):
        i = pl.program_id(0)

        @pl.when(i == 0)
        def _init():
            sum_scratch[...] = jnp.zeros_like(sum_scratch)
            sq_scratch[...] = jnp.zeros_like(sq_scratch)

        @pl.when(i < num_tiles)
        def _matmul_and_stats():
            # bf16 x / w1 on the MXU; f32 accumulation.  b1 is omitted: the
            # batch-mean subtraction of training-mode BatchNorm cancels it
            # exactly, and zero-padded rows then contribute exactly 0 here.
            h = jnp.dot(x_ref[...], w1_ref[...],
                        preferred_element_type=jnp.float32)
            row0 = pl.multiple_of(i * tb, tb)
            h_scratch[pl.ds(row0, tb), :] = h.astype(h_scratch.dtype)
            # Stats in f32 from the un-rounded matmul result; divisor uses the
            # true (un-padded) batch size.
            sum_scratch[...] = sum_scratch[...] + jnp.sum(h, axis=0, keepdims=True)
            sq_scratch[...] = sq_scratch[...] + jnp.sum(h * h, axis=0, keepdims=True)

        @pl.when(i == num_tiles)
        def _epilogue():
            # Fused BatchNorm affine computed once for the whole batch
            # (PyTorch training-mode semantics: biased variance).
            mean = sum_scratch[...] * inv_n
            var = sq_scratch[...] * inv_n - mean * mean
            scale = gamma_ref[...] * jax.lax.rsqrt(var + BN_EPS)
            shift = beta_ref[...] - mean * scale
            w2 = w2_ref[...]          # (1, HIDDEN)
            b2 = b2_ref[0, 0]         # scalar from SMEM

            def body(t, carry):
                r0 = pl.multiple_of(t * tb, tb)
                h = h_scratch[pl.ds(r0, tb), :].astype(jnp.float32)
                s = jax.nn.sigmoid(h * scale + shift)
                # (1,128) x (tb,128) -> (1,tb): projection lands directly in a
                # lane-dense row, so the output store is unmasked.
                row = jnp.einsum('od,td->ot', w2, s,
                                 preferred_element_type=jnp.float32)
                o_ref[pl.ds(t, 1), :] = jnp.tanh(row + b2).astype(o_ref.dtype)
                return carry

            jax.lax.fori_loop(0, num_tiles, body, 0, unroll=num_tiles <= 8)

    return kernel


def value_head(x, w1, b1, gamma, beta, w2, b2, *, tb=1024):
    """x: (B,512); w1: (512,128); b1: (1,128) [no-op under training-mode BN];
    gamma/beta: (1,128); w2: (128,1); b2: (1,1). Returns (B,1) f32."""
    del b1  # exactly cancelled by the batch-mean subtraction in training-mode BN
    B, F = x.shape
    assert F == IN_FEATURES

    # bf16 VMEM tiles are (16,128): keep batch tiles 16-aligned so the bf16
    # hidden scratch and the x blocks stay tile-aligned.
    tb = _round_up(max(16, min(tb, _round_up(B, 16))), 16)
    b_pad = _round_up(B, tb)
    num_tiles = b_pad // tb
    if b_pad != B:
        # Padded rows contribute exactly 0 to the BN sums (no b1); their
        # outputs are sliced off below and the divisor uses the true B.
        x = jnp.pad(x, ((0, b_pad - B), (0, 0)))

    # bf16 on the HBM stream + MXU; accumulation stays f32 inside the kernel.
    x_bf16 = x.astype(jnp.bfloat16)
    w1_bf16 = w1.astype(jnp.bfloat16)
    gamma = gamma.reshape(1, HIDDEN).astype(jnp.float32)
    beta = beta.reshape(1, HIDDEN).astype(jnp.float32)
    w2_row = w2.reshape(1, HIDDEN).astype(jnp.float32)
    b2 = b2.reshape(1, 1).astype(jnp.float32)

    need = (
        b_pad * HIDDEN * 2               # resident bf16 hidden-activation scratch
        + 2 * tb * IN_FEATURES * 2       # double-buffered bf16 x tiles
        + 2 * IN_FEATURES * HIDDEN * 2   # w1 (resident; double-buffer allocation)
        + 2 * num_tiles * tb * 4         # lane-dense output buffer
        + 64 * HIDDEN * 4                # per-feature vectors + slack
    )
    try:
        vmem_cap = pltpu.get_tpu_info().vmem_capacity_bytes
    except Exception:
        vmem_cap = 64 << 20
    # Leave headroom below physical VMEM (matters most on v7x's 64 MiB).
    vmem_limit = int(min(max(need + (8 << 20), 32 << 20), vmem_cap - (8 << 20)))

    out2d = pl.pallas_call(
        _make_kernel(tb, num_tiles, B),
        out_shape=jax.ShapeDtypeStruct((num_tiles, tb), jnp.float32),
        grid=(num_tiles + 1,),
        in_specs=[
            # Steps 0..num_tiles-1 stream x tile i; the epilogue step parks on
            # the last-fetched tile so no redundant DMA is issued.
            pl.BlockSpec((tb, IN_FEATURES),
                         lambda i: (jnp.minimum(i, num_tiles - 1), 0)),
            pl.BlockSpec((IN_FEATURES, HIDDEN), lambda i: (0, 0)),   # w1 (resident)
            pl.BlockSpec((1, HIDDEN), lambda i: (0, 0)),             # gamma
            pl.BlockSpec((1, HIDDEN), lambda i: (0, 0)),             # beta
            pl.BlockSpec((1, HIDDEN), lambda i: (0, 0)),             # w2 as a row
            pl.BlockSpec(memory_space=pltpu.MemorySpace.SMEM),       # b2 scalar
        ],
        # One resident lane-dense output block; filled by the epilogue, flushed
        # once to HBM after the final grid step.
        out_specs=pl.BlockSpec((num_tiles, tb), lambda i: (0, 0)),
        scratch_shapes=[
            pltpu.VMEM((b_pad, HIDDEN), jnp.bfloat16),   # resident hidden activations
            pltpu.VMEM((1, HIDDEN), jnp.float32),        # per-feature sum
            pltpu.VMEM((1, HIDDEN), jnp.float32),        # per-feature sum of squares
        ],
        compiler_params=pltpu.CompilerParams(
            # Sequential: every matmul step accumulates into the shared BN
            # statistics and must precede the epilogue.
            # TODO(synk): for very large B on v7x, split the stats into per-core
            # partials (core_map / VMEM_SHARED) so the batch axis can use both
            # TensorCores, and spill h to HBM instead of the VMEM scratch.
            dimension_semantics=("arbitrary",),
            vmem_limit_bytes=vmem_limit,
        ),
    )(x_bf16, w1_bf16, gamma, beta, w2_row, b2)

    return out2d.reshape(b_pad)[:B].reshape(B, OUT_FEATURES)


def reference(x, w1, b1, gamma, beta, w2, b2):
    """Faithful f32 PyTorch forward: Linear(+bias) -> BatchNorm1d (training-mode
    batch stats, biased variance) -> Sigmoid -> Linear -> Tanh."""
    h = x @ w1 + b1
    mean = jnp.mean(h, axis=0, keepdims=True)
    var = jnp.mean((h - mean) ** 2, axis=0, keepdims=True)
    h = (h - mean) / jnp.sqrt(var + BN_EPS) * gamma.reshape(1, -1) + beta.reshape(1, -1)
    h = jax.nn.sigmoid(h)
    return jnp.tanh(h @ w2 + b2.reshape(1, -1))


if __name__ == "__main__":
    key = jax.random.PRNGKey(0)
    k_x, k_w1, k_b1, k_g, k_bt, k_w2, k_b2 = jax.random.split(key, 7)

    B = 40    # not a tile multiple -> exercises the padding path
    TB = 16   # tiny batch tile so the demo exercises the multi-tile grid

    x = jax.random.normal(k_x, (B, IN_FEATURES), dtype=jnp.float32)

    bound1 = 1.0 / (IN_FEATURES ** 0.5)
    w1 = jax.random.uniform(k_w1, (IN_FEATURES, HIDDEN), jnp.float32, -bound1, bound1)
    b1 = jax.random.uniform(k_b1, (1, HIDDEN), jnp.float32, -bound1, bound1)

    gamma = 1.0 + 0.1 * jax.random.normal(k_g, (1, HIDDEN), jnp.float32)
    beta = 0.1 * jax.random.normal(k_bt, (1, HIDDEN), jnp.float32)

    bound2 = 1.0 / (HIDDEN ** 0.5)
    w2 = jax.random.uniform(k_w2, (HIDDEN, OUT_FEATURES), jnp.float32, -bound2, bound2)
    b2 = jax.random.uniform(k_b2, (1, OUT_FEATURES), jnp.float32, -bound2, bound2)

    out = value_head(x, w1, b1, gamma, beta, w2, b2, tb=TB)
    out = jax.block_until_ready(out)

    ref = reference(x, w1, b1, gamma, beta, w2, b2)
    assert out.shape == (B, OUT_FEATURES)
    max_err = jnp.max(jnp.abs(out - ref))
    # bf16 x/w1 + bf16 hidden scratch vs. a pure-f32 reference: errors stay
    # well under 1e-2 (BN renormalizes, f32 accumulation throughout).
    assert jnp.allclose(out, ref, atol=2e-2, rtol=2e-2), f"max abs diff {max_err}"

    print("KERNEL_OK")
</pallas_src>

<mosaic_0001>
module attributes {stable_mosaic.version = 11 : i64} {
  func.func @kernel(%arg0: i32, %arg1: memref<16x512xbf16, #tpu.memory_space<vmem>>, %arg2: memref<512x128xbf16, #tpu.memory_space<vmem>>, %arg3: memref<1x128xf32, #tpu.memory_space<vmem>>, %arg4: memref<1x128xf32, #tpu.memory_space<vmem>>, %arg5: memref<1x128xf32, #tpu.memory_space<vmem>>, %arg6: memref<1x1xf32, #tpu.memory_space<smem>>, %arg7: memref<3x16xf32, #tpu.memory_space<vmem>>, %arg8: memref<48x128xbf16, #tpu.memory_space<vmem>>, %arg9: memref<1x128xf32, #tpu.memory_space<vmem>>, %arg10: memref<1x128xf32, #tpu.memory_space<vmem>>) attributes {dimension_semantics = [#tpu.dimension_semantics<arbitrary>], iteration_bounds = array<i64: 4>, scalar_prefetch = 0 : i64, scratch_operands = 3 : i64, tpu.core_type = #tpu.core_type<tc>, window_params = [{transform_indices = @transform_0, window_bounds = array<i64: 16, 512>}, {pipeline_mode = #tpu.pipeline_mode<synchronous>, transform_indices = @transform_1, window_bounds = array<i64: 512, 128>}, {pipeline_mode = #tpu.pipeline_mode<synchronous>, transform_indices = @transform_2, window_bounds = array<i64: 1, 128>}, {pipeline_mode = #tpu.pipeline_mode<synchronous>, transform_indices = @transform_3, window_bounds = array<i64: 1, 128>}, {pipeline_mode = #tpu.pipeline_mode<synchronous>, transform_indices = @transform_4, window_bounds = array<i64: 1, 128>}, {transform_indices = @transform_5, window_bounds = array<i64: 1, 1>}, {pipeline_mode = #tpu.pipeline_mode<synchronous>, transform_indices = @transform_6, window_bounds = array<i64: 3, 16>}]} {
    %c0_i32 = arith.constant 0 : i32
    %0 = arith.cmpi eq, %arg0, %c0_i32 : i32
    %1 = arith.extui %0 : i1 to i32
    %c0_i32_0 = arith.constant 0 : i32
    %2 = arith.cmpi ne, %1, %c0_i32_0 : i32
    scf.if %2 {
      %cst = arith.constant 0.000000e+00 : f32
      %9 = vector.broadcast %cst : f32 to vector<1x128xf32>
      %c0 = arith.constant 0 : index
      %c0_4 = arith.constant 0 : index
      %10 = vector.load %arg9[%c0, %c0_4] : memref<1x128xf32, #tpu.memory_space<vmem>>, vector<1x128xf32>
      tpu.vector_store %arg9[%c0, %c0_4], %9 {strides = array<i32>} : memref<1x128xf32, #tpu.memory_space<vmem>>, vector<1x128xf32>,
      %cst_5 = arith.constant 0.000000e+00 : f32
      %11 = vector.broadcast %cst_5 : f32 to vector<1x128xf32>
      %c0_6 = arith.constant 0 : index
      %c0_7 = arith.constant 0 : index
      %12 = vector.load %arg10[%c0_6, %c0_7] : memref<1x128xf32, #tpu.memory_space<vmem>>, vector<1x128xf32>
      tpu.vector_store %arg10[%c0_6, %c0_7], %11 {strides = array<i32>} : memref<1x128xf32, #tpu.memory_space<vmem>>, vector<1x128xf32>,
    } else {
    }
    %c3_i32 = arith.constant 3 : i32
    %3 = arith.cmpi slt, %arg0, %c3_i32 : i32
    %4 = arith.extui %3 : i1 to i32
    %c0_i32_1 = arith.constant 0 : i32
    %5 = arith.cmpi ne, %4, %c0_i32_1 : i32
    scf.if %5 {
      %c0 = arith.constant 0 : index
      %c0_4 = arith.constant 0 : index
      %9 = vector.load %arg1[%c0, %c0_4] : memref<16x512xbf16, #tpu.memory_space<vmem>>, vector<16x512xbf16>
      %c0_5 = arith.constant 0 : index
      %c0_6 = arith.constant 0 : index
      %10 = vector.load %arg2[%c0_5, %c0_6] : memref<512x128xbf16, #tpu.memory_space<vmem>>, vector<512x128xbf16>
      %cst = arith.constant dense<0.000000e+00> : vector<16x128xf32>
      %11 = tpu.matmul %9, %10, %cst {dimension_numbers = #tpu.dot_dimension_numbers<[1], [0], [0], [1], [0, 0, 1, 1], [], []>} : vector<16x512xbf16>, vector<512x128xbf16>, vector<16x128xf32> -> vector<16x128xf32>
      %c16_i32 = arith.constant 16 : i32
      %12 = arith.muli %arg0, %c16_i32 : i32
      %13 = tpu.assume_multiple %12, 16 : i32
      %14 = arith.truncf %11 : vector<16x128xf32> to vector<16x128xbf16>
      %15 = arith.index_cast %13 : i32 to index
      %c0_7 = arith.constant 0 : index
      %16 = vector.load %arg8[%15, %c0_7] : memref<48x128xbf16, #tpu.memory_space<vmem>>, vector<16x128xbf16>
      tpu.vector_store %arg8[%15, %c0_7], %14 {strides = array<i32>} : memref<48x128xbf16, #tpu.memory_space<vmem>>, vector<16x128xbf16>,
      %c0_8 = arith.constant 0 : index
      %c0_9 = arith.constant 0 : index
      %17 = vector.load %arg9[%c0_8, %c0_9] : memref<1x128xf32, #tpu.memory_space<vmem>>, vector<1x128xf32>
      %cst_10 = arith.constant dense<0.000000e+00> : vector<128xf32>
      %18 = vector.multi_reduction <add>, %11, %cst_10 [0] : vector<16x128xf32> to vector<128xf32>
      %19 = vector.shape_cast %18 : vector<128xf32> to vector<1x128xf32>
      %20 = arith.addf %17, %19 : vector<1x128xf32>
      %c0_11 = arith.constant 0 : index
      %c0_12 = arith.constant 0 : index
      %21 = vector.load %arg9[%c0_11, %c0_12] : memref<1x128xf32, #tpu.memory_space<vmem>>, vector<1x128xf32>
      tpu.vector_store %arg9[%c0_11, %c0_12], %20 {strides = array<i32>} : memref<1x128xf32, #tpu.memory_space<vmem>>, vector<1x128xf32>,
      %c0_13 = arith.constant 0 : index
      %c0_14 = arith.constant 0 : index
      %22 = vector.load %arg10[%c0_13, %c0_14] : memref<1x128xf32, #tpu.memory_space<vmem>>, vector<1x128xf32>
      %23 = arith.mulf %11, %11 : vector<16x128xf32>
      %cst_15 = arith.constant dense<0.000000e+00> : vector<128xf32>
      %24 = vector.multi_reduction <add>, %23, %cst_15 [0] : vector<16x128xf32> to vector<128xf32>
      %25 = vector.shape_cast %24 : vector<128xf32> to vector<1x128xf32>
      %26 = arith.addf %22, %25 : vector<1x128xf32>
      %c0_16 = arith.constant 0 : index
      %c0_17 = arith.constant 0 : index
      %27 = vector.load %arg10[%c0_16, %c0_17] : memref<1x128xf32, #tpu.memory_space<vmem>>, vector<1x128xf32>
      tpu.vector_store %arg10[%c0_16, %c0_17], %26 {strides = array<i32>} : memref<1x128xf32, #tpu.memory_space<vmem>>, vector<1x128xf32>,
    } else {
    }
    %c3_i32_2 = arith.constant 3 : i32
    %6 = arith.cmpi eq, %arg0, %c3_i32_2 : i32
    %7 = arith.extui %6 : i1 to i32
    %c0_i32_3 = arith.constant 0 : i32
    %8 = arith.cmpi ne, %7, %c0_i32_3 : i32
    scf.if %8 {
      %c0 = arith.constant 0 : index
      %c0_4 = arith.constant 0 : index
      %9 = vector.load %arg9[%c0, %c0_4] : memref<1x128xf32, #tpu.memory_space<vmem>>, vector<1x128xf32>
      %cst = arith.constant 2.500000e-02 : f32
      %10 = vector.broadcast %cst : f32 to vector<1x128xf32>
      %11 = arith.mulf %9, %10 : vector<1x128xf32>
      %c0_5 = arith.constant 0 : index
      %c0_6 = arith.constant 0 : index
      %12 = vector.load %arg10[%c0_5, %c0_6] : memref<1x128xf32, #tpu.memory_space<vmem>>, vector<1x128xf32>
      %cst_7 = arith.constant 2.500000e-02 : f32
      %13 = vector.broadcast %cst_7 : f32 to vector<1x128xf32>
      %14 = arith.mulf %12, %13 : vector<1x128xf32>
      %15 = arith.mulf %11, %11 : vector<1x128xf32>
      %16 = arith.subf %14, %15 : vector<1x128xf32>
      %c0_8 = arith.constant 0 : index
      %c0_9 = arith.constant 0 : index
      %17 = vector.load %arg3[%c0_8, %c0_9] : memref<1x128xf32, #tpu.memory_space<vmem>>, vector<1x128xf32>
      %cst_10 = arith.constant 9.99999974E-6 : f32
      %18 = vector.broadcast %cst_10 : f32 to vector<1x128xf32>
      %19 = arith.addf %16, %18 : vector<1x128xf32>
      %20 = math.rsqrt %19 : vector<1x128xf32>
      %21 = arith.mulf %17, %20 : vector<1x128xf32>
      %c0_11 = arith.constant 0 : index
      %c0_12 = arith.constant 0 : index
      %22 = vector.load %arg4[%c0_11, %c0_12] : memref<1x128xf32, #tpu.memory_space<vmem>>, vector<1x128xf32>
      %23 = arith.mulf %11, %21 : vector<1x128xf32>
      %24 = arith.subf %22, %23 : vector<1x128xf32>
      %c0_13 = arith.constant 0 : index
      %c0_14 = arith.constant 0 : index
      %25 = vector.load %arg5[%c0_13, %c0_14] : memref<1x128xf32, #tpu.memory_space<vmem>>, vector<1x128xf32>
      %c0_15 = arith.constant 0 : index
      %c0_16 = arith.constant 0 : index
      %26 = memref.load %arg6[%c0_15, %c0_16] : memref<1x1xf32, #tpu.memory_space<smem>>
      %c0_i32_17 = arith.constant 0 : i32
      %c16_i32 = arith.constant 16 : i32
      %27 = arith.muli %c0_i32_17, %c16_i32 : i32
      %28 = tpu.assume_multiple %27, 16 : i32
      %29 = arith.index_cast %28 : i32 to index
      %c0_18 = arith.constant 0 : index
      %30 = vector.load %arg8[%29, %c0_18] : memref<48x128xbf16, #tpu.memory_space<vmem>>, vector<16x128xbf16>
      %31 = arith.extf %30 : vector<16x128xbf16> to vector<16x128xf32>
      %32 = vector.broadcast %21 : vector<1x128xf32> to vector<16x128xf32>
      %33 = arith.mulf %31, %32 : vector<16x128xf32>
      %34 = vector.broadcast %24 : vector<1x128xf32> to vector<16x128xf32>
      %35 = arith.addf %33, %34 : vector<16x128xf32>
      %36 = arith.negf %35 : vector<16x128xf32>
      %37 = math.exp %36 : vector<16x128xf32>
      %cst_19 = arith.constant 1.000000e+00 : f32
      %38 = vector.broadcast %cst_19 : f32 to vector<16x128xf32>
      %39 = arith.addf %38, %37 : vector<16x128xf32>
      %40 = arith.divf %38, %39 : vector<16x128xf32>
      "tpu.trace_start"() <{level = 10 : i32, message = "od,td->ot"}> : () -> ()
      %cst_20 = arith.constant dense<0.000000e+00> : vector<1x16xf32>
      %41 = tpu.matmul %25, %40, %cst_20 {dimension_numbers = #tpu.dot_dimension_numbers<[1], [1], [0], [0], [0, 0, 1, 0], [], []>} : vector<1x128xf32>, vector<16x128xf32>, vector<1x16xf32> -> vector<1x16xf32>
      "tpu.trace_stop"() : () -> ()
      %42 = vector.broadcast %26 : f32 to vector<1x16xf32>
      %43 = arith.addf %41, %42 : vector<1x16xf32>
      %44 = math.tanh %43 : vector<1x16xf32>
      %45 = arith.index_cast %c0_i32_17 : i32 to index
      %c0_21 = arith.constant 0 : index
      %46 = vector.load %arg7[%45, %c0_21] : memref<3x16xf32, #tpu.memory_space<vmem>>, vector<1x16xf32>
      tpu.vector_store %arg7[%45, %c0_21], %44 {strides = array<i32>} : memref<3x16xf32, #tpu.memory_space<vmem>>, vector<1x16xf32>,
      %c1_i32 = arith.constant 1 : i32
      %c16_i32_22 = arith.constant 16 : i32
      %47 = arith.muli %c1_i32, %c16_i32_22 : i32
      %48 = tpu.assume_multiple %47, 16 : i32
      %49 = arith.index_cast %48 : i32 to index
      %c0_23 = arith.constant 0 : index
      %50 = vector.load %arg8[%49, %c0_23] : memref<48x128xbf16, #tpu.memory_space<vmem>>, vector<16x128xbf16>
      %51 = arith.extf %50 : vector<16x128xbf16> to vector<16x128xf32>
      %52 = vector.broadcast %21 : vector<1x128xf32> to vector<16x128xf32>
      %53 = arith.mulf %51, %52 : vector<16x128xf32>
      %54 = vector.broadcast %24 : vector<1x128xf32> to vector<16x128xf32>
      %55 = arith.addf %53, %54 : vector<16x128xf32>
      %56 = arith.negf %55 : vector<16x128xf32>
      %57 = math.exp %56 : vector<16x128xf32>
      %cst_24 = arith.constant 1.000000e+00 : f32
      %58 = vector.broadcast %cst_24 : f32 to vector<16x128xf32>
      %59 = arith.addf %58, %57 : vector<16x128xf32>
      %60 = arith.divf %58, %59 : vector<16x128xf32>
      "tpu.trace_start"() <{level = 10 : i32, message = "od,td->ot"}> : () -> ()
      %cst_25 = arith.constant dense<0.000000e+00> : vector<1x16xf32>
      %61 = tpu.matmul %25, %60, %cst_25 {dimension_numbers = #tpu.dot_dimension_numbers<[1], [1], [0], [0], [0, 0, 1, 0], [], []>} : vector<1x128xf32>, vector<16x128xf32>, vector<1x16xf32> -> vector<1x16xf32>
      "tpu.trace_stop"() : () -> ()
      %62 = vector.broadcast %26 : f32 to vector<1x16xf32>
      %63 = arith.addf %61, %62 : vector<1x16xf32>
      %64 = math.tanh %63 : vector<1x16xf32>
      %65 = arith.index_cast %c1_i32 : i32 to index
      %c0_26 = arith.constant 0 : index
      %66 = vector.load %arg7[%65, %c0_26] : memref<3x16xf32, #tpu.memory_space<vmem>>, vector<1x16xf32>
      tpu.vector_store %arg7[%65, %c0_26], %64 {strides = array<i32>} : memref<3x16xf32, #tpu.memory_space<vmem>>, vector<1x16xf32>,
      %c2_i32 = arith.constant 2 : i32
      %c16_i32_27 = arith.constant 16 : i32
      %67 = arith.muli %c2_i32, %c16_i32_27 : i32
      %68 = tpu.assume_multiple %67, 16 : i32
      %69 = arith.index_cast %68 : i32 to index
      %c0_28 = arith.constant 0 : index
      %70 = vector.load %arg8[%69, %c0_28] : memref<48x128xbf16, #tpu.memory_space<vmem>>, vector<16x128xbf16>
      %71 = arith.extf %70 : vector<16x128xbf16> to vector<16x128xf32>
      %72 = vector.broadcast %21 : vector<1x128xf32> to vector<16x128xf32>
      %73 = arith.mulf %71, %72 : vector<16x128xf32>
      %74 = vector.broadcast %24 : vector<1x128xf32> to vector<16x128xf32>
      %75 = arith.addf %73, %74 : vector<16x128xf32>
      %76 = arith.negf %75 : vector<16x128xf32>
      %77 = math.exp %76 : vector<16x128xf32>
      %cst_29 = arith.constant 1.000000e+00 : f32
      %78 = vector.broadcast %cst_29 : f32 to vector<16x128xf32>
      %79 = arith.addf %78, %77 : vector<16x128xf32>
      %80 = arith.divf %78, %79 : vector<16x128xf32>
      "tpu.trace_start"() <{level = 10 : i32, message = "od,td->ot"}> : () -> ()
      %cst_30 = arith.constant dense<0.000000e+00> : vector<1x16xf32>
      %81 = tpu.matmul %25, %80, %cst_30 {dimension_numbers = #tpu.dot_dimension_numbers<[1], [1], [0], [0], [0, 0, 1, 0], [], []>} : vector<1x128xf32>, vector<16x128xf32>, vector<1x16xf32> -> vector<1x16xf32>
      "tpu.trace_stop"() : () -> ()
      %82 = vector.broadcast %26 : f32 to vector<1x16xf32>
      %83 = arith.addf %81, %82 : vector<1x16xf32>
      %84 = math.tanh %83 : vector<1x16xf32>
      %85 = arith.index_cast %c2_i32 : i32 to index
      %c0_31 = arith.constant 0 : index
      %86 = vector.load %arg7[%85, %c0_31] : memref<3x16xf32, #tpu.memory_space<vmem>>, vector<1x16xf32>
      tpu.vector_store %arg7[%85, %c0_31], %84 {strides = array<i32>} : memref<3x16xf32, #tpu.memory_space<vmem>>, vector<1x16xf32>,
      %c3_i32_32 = arith.constant 3 : i32
    } else {
    }
    return
  }
  func.func @transform_0(%arg0: i32) -> (i32, i32) {
    %c2_i32 = arith.constant 2 : i32
    %0 = arith.minsi %arg0, %c2_i32 : i32
    %c0_i32 = arith.constant 0 : i32
    %c0_i32_0 = arith.constant 0 : i32
    return %0, %c0_i32 : i32, i32
  }
  func.func @transform_1(%arg0: i32) -> (i32, i32) {
    %c0_i32 = arith.constant 0 : i32
    %c0_i32_0 = arith.constant 0 : i32
    %c0_i32_1 = arith.constant 0 : i32
    return %c0_i32, %c0_i32_0 : i32, i32
  }
  func.func @transform_2(%arg0: i32) -> (i32, i32) {
    %c0_i32 = arith.constant 0 : i32
    %c0_i32_0 = arith.constant 0 : i32
    %c0_i32_1 = arith.constant 0 : i32
    return %c0_i32, %c0_i32_0 : i32, i32
  }
  func.func @transform_3(%arg0: i32) -> (i32, i32) {
    %c0_i32 = arith.constant 0 : i32
    %c0_i32_0 = arith.constant 0 : i32
    %c0_i32_1 = arith.constant 0 : i32
    return %c0_i32, %c0_i32_0 : i32, i32
  }
  func.func @transform_4(%arg0: i32) -> (i32, i32) {
    %c0_i32 = arith.constant 0 : i32
    %c0_i32_0 = arith.constant 0 : i32
    %c0_i32_1 = arith.constant 0 : i32
    return %c0_i32, %c0_i32_0 : i32, i32
  }
  func.func @transform_5(%arg0: i32) -> (i32, i32) {
    %c0_i32 = arith.constant 0 : i32
    %c0_i32_0 = arith.constant 0 : i32
    %c0_i32_1 = arith.constant 0 : i32
    return %c0_i32, %c0_i32_0 : i32, i32
  }
  func.func @transform_6(%arg0: i32) -> (i32, i32) {
    %c0_i32 = arith.constant 0 : i32
    %c0_i32_0 = arith.constant 0 : i32
    %c0_i32_1 = arith.constant 0 : i32
    return %c0_i32, %c0_i32_0 : i32, i32
  }
}

</mosaic_0001>

<bundles_post_ra>
// kernel: tpu_custom_call.1
= control target key start
LH: loop header
LB: loop body
LE: loop exit
PB: predicated region body
PF: predicated region fallthrough
CT: control target
= control target key end

     0   :  { %s1717_s0 = inlined_call_operand.hbm [shape: bf16[48,512], index: 0, kind: input, shape index: {}]   ;;  %s1718_s1 = inlined_call_operand.hbm [shape: bf16[512,128], index: 1, kind: input, shape index: {}]   ;;  %s1719_s2 = inlined_call_operand.vmem [shape: f32[1,128], index: 2, kind: input, shape index: {}]   ;;  %s1720_s3 = inlined_call_operand.vmem [shape: f32[1,128], index: 3, kind: input, shape index: {}]   ;;  %s1721_s4 = inlined_call_operand.vmem [shape: f32[1,128], index: 4, kind: input, shape index: {}]   ;;  %s1722_s5 = inlined_call_operand.<no memory space> [shape: f32[1,1], index: 5, kind: input, shape index: {}]   ;;  %s1723_s6 = inlined_call_operand.hbm [shape: f32[3,16], index: 6, kind: output, shape index: {}]  }
   0x1   :  { %11 = sst [smem:[#allocation5]] %s1722_s5 }
   0x2   :  { %12 = vsyncpa [#allocation7], 0 }
   0x3   :  { %14 = vsyncpa [#allocation7 + $0x1], 0 }
   0x4   :  { %15 = vsyncpa [#allocation10], 0 }
   0x5   :  { %16 = vsyncpa [#allocation8], 0  ;;  %s1522_s23 = smov 0   ;;  %s1524_s24 = smov 0  }
   0x6   :  { %s1526_s25 = smov 0   ;;  %s1528_s26 = smov 0  }
   0x7 LB: > { %s1541_s5 = sadd.s32 4294967295, %s1471_s26   ;;  %p46_p0 = scmp.ne.s32.totalorder %s1463_s24, %s1459_s23  ;;  %s1471_s26 = sphi %s1528_s26, %s1741_s26   ;;  %s1467_s25 = sphi %s1526_s25, %s1740_s25   ;;  %s1463_s24 = sphi %s1524_s24, %s1739_s24   ;;  %s1459_s23 = sphi %s1522_s23, %s1738_s23  }
   0x8   : > { %p1724_p1 = scmp.eq.s32.totalorder %s1541_s5, 0  ;;  %p1064_p2 = scmp.ge.s32.totalorder %s1471_s26, 1 }
   0x9   : > { %p183_p3 = scmp.lt.s32.totalorder %s1471_s26, 5  ;;  %s1473_s29 = smov [#allocation9]  }
   0xa   : > { %p1550_p5 = por %p1724_p1, %p46_p0  ;;  %s195_s30 = sshll.u32 %s1473_s29, 4  ;;  %s196_s30 = int_to_ptr.vmem [resolvable:$true] %s195_s30 }
   0xb   : > { %p1554_p6 = pnand %p1064_p2, %p183_p3  ;;  %s1567_s8 = sadd.s32 1, %s1471_s26  }
   0xc   : > { %s1727_s27 = scalar_select %p1550_p5, 1, 0 }
   0xd   : > { %s1728_s28 = scalar_select %p1554_p6, 1, 0 }
   0xe   : > { %p1220_p7 = pneg %p1554_p6  ;;  %s1345_s11 = scalar_lea.hbm %s1718_s1, 4096 }
   0xf   : > { %p1346_p11 = scmp.ne.s32.totalorder %s1718_s1, %s1345_s11  ;;  %p1352_p2 = scmp.lt.u32.totalorder %s1345_s11, %s1718_s1 }
  0x10   : > { %p1562_p8 = pnand %p1220_p7, %p1724_p1 }
  0x12   : > { %p1347_p12 = pneg %p1562_p8 }
  0x14   : > { %p1348_p13 = pnand %p1347_p12, %p1346_p11 }
  0x16   : > { %p1349_p0 = pneg %p1348_p13 }
  0x18   : > { %p1354_p3 = pnand %p1352_p2, %p1349_p0 }
  0x1a   : > { %1357 = shalt.err (!%p1354_p3)
}
  0x1b   : > { %s1358_s16 = scalar_lea.vmem %s196_s30, 4096  ;;  %p1366_p10 = scmp.lt.s32.totalorder %s196_s30, %s196_s30 }
  0x1c   : > { %p1359_p7 = scmp.ne.s32.totalorder %s196_s30, %s1358_s16  ;;  %p1367_p9 = scmp.lt.s32.totalorder %s1358_s16, %s1358_s16 }
  0x1e   : > { %p1361_p4 = pnand %p1359_p7, %p1347_p12  ;;  %p1368_p5 = por %p1367_p9, %p1366_p10 }
  0x20   : > { %p1362_p1 = pneg %p1361_p4 }
  0x22   : > { %p1369_p6 = pnand %p1368_p5, %p1362_p1 }
  0x24   : > { %1372 = shalt.err (!%p1369_p6)
}
  0x25   : > { %s1474_s17 = smov 64   ;;  %s1475_s18 = smov 4  }
  0x26   : > { %1223 = dma.hbm_to_vmem [thread:$0]  (!%p1562_p8), %s1718_s1, 4096, %s196_s30, [#allocation10], %s1474_s17, %s1474_s17, %s1475_s18  }
  0x27   : > { %p1730_p1 = scmp.lt.s32.totalorder %s1471_s26, 2  ;;  %p1731_p4 = scmp.lt.s32.totalorder %s1567_s8, 2 }
  0x28   : > { %s33_s23 = sadd.s32 1, %s1467_s25  ;;  %p40_p5 = scmp.ne.s32.totalorder %s1467_s25, %s1463_s24 }
  0x29   : > { %s27_s21 = scalar_select %p1730_p1, %s1471_s26, 2 }
  0x2a   : > { %s29_s22 = scalar_select %p1731_p4, %s1567_s8, 2 }
  0x2b   : > { %p41_p6 = scmp.eq.s32.totalorder %s1471_s26, 0  ;;  %p1229_p10 = scmp.lt.s32.totalorder %s1471_s26, 4 }
  0x2c   : > { %s30_s29 = ssub.s32 %s27_s21, %s29_s22  ;;  %s221_s9 = sand.u32 1, %s1467_s25  }
  0x2d   : > { %p31_p9 = scmp.eq.s32.totalorder %s30_s29, 0  ;;  %p42_p11 = por %p41_p6, %p40_p5 }
  0x2e   : > { %s1067_s11 = sshll.u32 %s221_s9, 5  ;;  %s1126_s7 = sshll.u32 %s27_s21, 9 }
  0x2f   : > { %s1600_s10 = scalar_select %p31_p9, %s1467_s25, %s33_s23  }
  0x30   : > { %s1605_s30 = scalar_lea.hbm %s1717_s0, %s1126_s7  ;;  %s225_s14 = scalar_lea.vmem [#allocation6], %s1067_s11 }
  0x31   : > { %s235_s15 = sshll.u32 %s225_s14, 4  ;;  %p1609_p8 = pnand %p1229_p10, %p42_p11  ;;  %s1607_s15 = int_to_ptr.vmem [resolvable:$true] %s235_s15 }
  0x32   : > { %s1613_s16 = scalar_lea.sflag [#allocation7], %s221_s9  ;;  %s1373_s17 = scalar_lea.hbm %s1605_s30, 512 }
  0x33   : > { %p1374_p12 = scmp.ne.s32.totalorder %s1605_s30, %s1373_s17  ;;  %p1375_p13 = pneg %p1609_p8 }
  0x34   : > { %s1378_s20 = scalar_lea.hbm %s1717_s0, 1536  ;;  %p1379_p3 = scmp.lt.u32.totalorder %s1605_s30, %s1717_s0 }
  0x35   : > { %p1376_p0 = pnand %p1375_p13, %p1374_p12  ;;  %p1380_p7 = scmp.lt.u32.totalorder %s1378_s20, %s1373_s17 }
  0x36   : > { %p1382_p4 = scmp.lt.u32.totalorder %s1373_s17, %s1605_s30 }
  0x37   : > { %p1377_p2 = pneg %p1376_p0  ;;  %p1381_p1 = por %p1380_p7, %p1379_p3 }
  0x39   : > { %p1383_p5 = por %p1382_p4, %p1381_p1 }
  0x3b   : > { %p1384_p6 = pnand %p1383_p5, %p1377_p2 }
  0x3d   : > { %1387 = shalt.err (!%p1384_p6)
}
  0x3e   : > { %s1388_s23 = scalar_lea.vmem %s1607_s15, 512  ;;  %s1476_s29 = smov [#allocation6]  }
  0x3f   : > { %p1389_p9 = scmp.ne.s32.totalorder %s1607_s15, %s1388_s23  ;;  %s1393_s9 = sshll.u32 %s1476_s29, 4  ;;  %s1394_s9 = int_to_ptr.vmem [resolvable:$false] %s1393_s9 }
  0x40   : > { %s1395_s11 = scalar_lea.vmem %s1394_s9, 1024  ;;  %p1396_p12 = scmp.lt.s32.totalorder %s1607_s15, %s1394_s9 }
  0x41   : > { %p1391_p10 = pnand %p1389_p9, %p1375_p13  ;;  %p1397_p0 = scmp.lt.s32.totalorder %s1395_s11, %s1388_s23 }
  0x43   : > { %p1392_p11 = pneg %p1391_p10  ;;  %p1398_p3 = por %p1397_p0, %p1396_p12 }
  0x45   : > { %p1399_p7 = pnand %p1398_p3, %p1392_p11 }
  0x47   : > { %1402 = shalt.err (!%p1399_p7)
}
  0x48   : > { %s1477_s7 = smov 256   ;;  %s1478_s12 = smov 16  }
  0x49   : > { %1227 = dma.hbm_to_vmem [thread:$0]  (!%p1609_p8), %s1605_s30, 512, %s1607_s15, %s1613_s16, %s1477_s7, %s1477_s7, %s1478_s12  }
  0x4a   : > { %p1733_p13 = scmp.ne.s32.totalorder %s1728_s28, 0 }
  0x4b   : > { %s249_s13 = sand.u32 (!%p1733_p13), 1, %s1463_s24   ;;  %p1734_p2 = scmp.ne.s32.totalorder (!%p1733_p13), %s1727_s27, 0 }
  0x4c   : > { %247 = sbr.rel (%p1733_p13) target bundleno = 699 (0x2bb), region = 44  ;;  %s1072_s14 = sshll.u32 (!%p1733_p13), %s249_s13, 5 }
  0x4d   : > { %s250_s17 = scalar_lea.sflag (!%p1733_p13), [#allocation7], %s249_s13  ;;  %s1644_s18 = scalar_lea.vmem (!%p1733_p13), [#allocation6], %s1072_s14 }
  0x53   : > { %1446 = dma.done.wait (%p1734_p2), %s250_s17, 512  }
  0x54   : > { %1448 = vsyncadd (%p1734_p2), %s250_s17, 4294966784  ;;  %p1735_p1 = scmp.eq.s32.totalorder %s1541_s5, 0 }
  0x56   : > { %1450 = dma.done.wait (%p1735_p1), [#allocation10], 4096   ;;  %p1736_p8 = pmov %p1735_p1 }
  0x57   : > { %p1737_p4 = scmp.ne.s32.totalorder %s1541_s5, 0 }
  0x58   : > { %1452 = vsyncadd (%p1736_p8), [#allocation10], 4294963200  ;;  %v1479_v0 = vmov (!%p1737_p4), 0.0  }
  0x59   : > { %288 = sbr.rel (%p1737_p4) target bundleno = 96 (0x60), region = 56  ;;  %289 = vst [vmem:[#allocation3] sm:$0x1] (!%p1737_p4), %v1479_v0  ;;  %290 = vst [vmem:[#allocation4] sm:$0x1] (!%p1737_p4), %v1479_v0 }
  0x60 PF: > { %p1075_p5 = scmp.ge.s32.totalorder %s1541_s5, 3 }
  0x61   : > { %v1275_v1 = vld [vmem:[#allocation9 + $0x40] sm:$0xff] (!%p1075_p5)   ;;  %v1279_v5 = vld [vmem:[#allocation9 + $0x48] sm:$0xff] (!%p1075_p5)   ;;  %v1283_v9 = vld [vmem:[#allocation9 + $0x50] sm:$0xff] (!%p1075_p5)   ;;  %s1112_s27 = sshll.u32 (!%p1075_p5), %s1541_s5, 4 }
  0x62   : > { %294 = sbr.rel (%p1075_p5) target bundleno = 370 (0x172), region = 60  ;;  %v1276_v2 = vld [vmem:[#allocation9 + $0xc0] sm:$0xff] (!%p1075_p5)   ;;  %1127 = vmatprep.subr.bf16.mxu0 (!%p1075_p5), %v1275_v1  ;;  %v1280_v6 = vld [vmem:[#allocation9 + $0xc8] sm:$0xff] (!%p1075_p5)   ;;  %v1284_v10 = vld [vmem:[#allocation9 + $0xd0] sm:$0xff] (!%p1075_p5)   ;;  %s659_s28 = sshra.s32 (!%p1075_p5), %s1112_s27, 4 }
  0x63   : > { %v1277_v3 = vld [vmem:[#allocation9] sm:$0xff] (!%p1075_p5)   ;;  %1149 = vmatprep.subr.bf16.mxu1 (!%p1075_p5), %v1276_v2  ;;  %v1281_v7 = vld [vmem:[#allocation9 + $0x8] sm:$0xff] (!%p1075_p5)   ;;  %v1285_v11 = vld [vmem:[#allocation9 + $0x10] sm:$0xff] (!%p1075_p5)   ;;  %s1113_s30 = sshll.u32 (!%p1075_p5), %s659_s28, 3 }
  0x64   : > { %v1278_v4 = vld [vmem:[#allocation9 + $0x80] sm:$0xff] (!%p1075_p5)   ;;  %1128 = vmatpush3.bf16.msra.mxu0 (!%p1075_p5), %v1277_v3  ;;  %v1282_v8 = vld [vmem:[#allocation9 + $0x88] sm:$0xff] (!%p1075_p5)   ;;  %v1286_v12 = vld [vmem:[#allocation9 + $0x90] sm:$0xff] (!%p1075_p5)   ;;  %s662_s15 = scalar_lea.vmem (!%p1075_p5), [#allocation2], %s1113_s30 }
  0x65   : > { %1150 = vmatpush3.bf16.msra.mxu1 (!%p1075_p5), %v1278_v4  ;;  %1129 = vmatprep.subr.bf16.mxu0 (!%p1075_p5), %v1279_v5  ;;  %v1287_v13 = vld [vmem:[#allocation9 + $0x58] sm:$0xff] (!%p1075_p5)   ;;  %v1291_v17 = vld [vmem:[#allocation9 + $0x60] sm:$0xff] (!%p1075_p5)   ;;  %v1295_v21 = vld [vmem:[#allocation9 + $0x68] sm:$0xff] (!%p1075_p5)  }
  0x66   : > { %1151 = vmatprep.subr.bf16.mxu1 (!%p1075_p5), %v1280_v6  ;;  %v1288_v14 = vld [vmem:[#allocation9 + $0xd8] sm:$0xff] (!%p1075_p5)   ;;  %v1292_v18 = vld [vmem:[#allocation9 + $0xe0] sm:$0xff] (!%p1075_p5)   ;;  %v1296_v22 = vld [vmem:[#allocation9 + $0xe8] sm:$0xff] (!%p1075_p5)  }
  0x67   : > { %v1289_v15 = vld [vmem:[#allocation9 + $0x18] sm:$0xff] (!%p1075_p5)   ;;  %v1293_v19 = vld [vmem:[#allocation9 + $0x20] sm:$0xff] (!%p1075_p5)   ;;  %v1297_v23 = vld [vmem:[#allocation9 + $0x28] sm:$0xff] (!%p1075_p5)  }
  0x68   : > { %1130 = vmatpush3.bf16.msra.mxu0 (!%p1075_p5), %v1281_v7  ;;  %v1290_v16 = vld [vmem:[#allocation9 + $0x98] sm:$0xff] (!%p1075_p5)   ;;  %v1294_v20 = vld [vmem:[#allocation9 + $0xa0] sm:$0xff] (!%p1075_p5)   ;;  %v1298_v24 = vld [vmem:[#allocation9 + $0xa8] sm:$0xff] (!%p1075_p5)  }
  0x69   : > { %1152 = vmatpush3.bf16.msra.mxu1 %v1282_v8  ;;  %1131 = vmatprep.subr.bf16.mxu0 %v1283_v9  ;;  %v1299_v25 = vld [vmem:[#allocation9 + $0x70] sm:$0xff]   ;;  %v1303_v29 = vld [vmem:[#allocation9 + $0x78] sm:$0xff]  }
  0x6a   : > { %1153 = vmatprep.subr.bf16.mxu1 %v1284_v10  ;;  %v1300_v26 = vld [vmem:[#allocation9 + $0xf0] sm:$0xff]   ;;  %v1304_v30 = vld [vmem:[#allocation9 + $0xf8] sm:$0xff]  }
  0x6b   : > { %v1301_v27 = vld [vmem:[#allocation9 + $0x30] sm:$0xff]   ;;  %v1305_v31 = vld [vmem:[#allocation9 + $0x38] sm:$0xff]  }
  0x6c   : > { %1132 = vmatpush3.bf16.msra.mxu0 %v1285_v11  ;;  %v1302_v28 = vld [vmem:[#allocation9 + $0xb0] sm:$0xff]   ;;  %v1306_v32 = vld [vmem:[#allocation9 + $0xb8] sm:$0xff]  }
  0x6d   : > { %1154 = vmatpush3.bf16.msra.mxu1 %v1286_v12  ;;  %1133 = vmatprep.subr.bf16.mxu0 %v1287_v13  ;;  %v1307_v33 = vld [vmem:[%s1644_s18] ss:$16 sps:$4 sm:$0xff]   ;;  %v1309_v34 = vld [vmem:[%s1644_s18 + $0x4] ss:$16 sps:$4 sm:$0xff]   ;;  %v1310_v35 = vld [vmem:[%s1644_s18 + $0x8] ss:$16 sps:$4 sm:$0xff]  }
  0x6e   : > { %1155 = vmatprep.subr.bf16.mxu1 %v1288_v14  ;;  %v1312_v36 = vld [vmem:[%s1644_s18 + $0xc] ss:$16 sps:$4 sm:$0xff]   ;;  %607 = vmatprep.mubr.bf16.mxu0 %v1309_v34 }
  0x6f   : > { %648 = vmatprep.mubr.bf16.mxu1 %v1312_v36  ;;  %v664_v1 = vld [vmem:[#allocation3] sm:$0x1]  ;;  %v674_v4 = vld [vmem:[#allocation4] sm:$0x1] }
  0x70   : > { %1134 = vmatpush3.bf16.msra.mxu0 %v1289_v15 }
  0x71   : > { %1156 = vmatpush3.bf16.msra.mxu1 %v1290_v16  ;;  %1135 = vmatprep.subr.bf16.mxu0 %v1291_v17 }
  0x72   : > { %1157 = vmatprep.subr.bf16.mxu1 %v1292_v18 }
  0x74   : > { %1136 = vmatpush3.bf16.msra.mxu0 %v1293_v19 }
  0x75   : > { %1158 = vmatpush3.bf16.msra.mxu1 %v1294_v20  ;;  %1137 = vmatprep.subr.bf16.mxu0 %v1295_v21 }
  0x76   : > { %1159 = vmatprep.subr.bf16.mxu1 %v1296_v22 }
  0x78   : > { %1138 = vmatpush3.bf16.msra.mxu0 %v1297_v23 }
  0x79   : > { %1160 = vmatpush3.bf16.msra.mxu1 %v1298_v24  ;;  %1139 = vmatprep.subr.bf16.mxu0 %v1299_v25 }
  0x7a   : > { %1161 = vmatprep.subr.bf16.mxu1 %v1300_v26 }
  0x7c   : > { %1140 = vmatpush3.bf16.msra.mxu0 %v1301_v27 }
  0x7d   : > { %1162 = vmatpush3.bf16.msra.mxu1 %v1302_v28  ;;  %1141 = vmatprep.subr.bf16.mxu0 %v1303_v29 }
  0x7e   : > { %1163 = vmatprep.subr.bf16.mxu1 %v1304_v30 }
  0x80   : > { %1142 = vmatpush3.bf16.msra.mxu0 %v1305_v31 }
  0x81   : > { %1164 = vmatpush3.bf16.msra.mxu1 %v1306_v32 }
  0x83   : > { %608 = vmatmul.mubr.bf16.vlgmr.msra.gmra.mrb[0].mxu0 %v1307_v33 }
  0x84   : > { %649 = vmatmul.mubr.bf16.vlgmr.msra.gmra.mrb[0].mxu1 %v1310_v35 }
 0x156   : > { %v1143_v37 = vpop.f32.mrb[0].mxu0 }
 0x157   : > { %v1165_v38 = vpop.f32.mrb[0].mxu1  ;;  %v1144_v39 = vpop.f32.mrb[1].mxu0 }
 0x158   : > { %v1145_v40 = vadd.f32 %v1144_v39, %v1143_v37  ;;  %v1166_v41 = vpop.f32.mrb[1].mxu1  ;;  %v1146_v42 = vpop.f32.mrb[2].mxu0 }
 0x159   : > { %v1167_v43 = vadd.f32 %v1166_v41, %v1165_v38  ;;  %v1168_v44 = vpop.f32.mrb[2].mxu1  ;;  %v1147_v45 = vpop.f32.mrb[3].mxu0 }
 0x15a   : > { %v1148_v46 = vadd.f32 %v1147_v45, %v1146_v42  ;;  %v1169_v47 = vpop.f32.mrb[3].mxu1 }
 0x15b   : > { %v651_v48 = vadd.f32 %v1167_v43, %v1145_v40  ;;  %v1170_v49 = vadd.f32 %v1169_v47, %v1168_v44 }
 0x15d   : > { %v654_v50 = vadd.f32 %v1170_v49, %v1148_v46  ;;  %v675_v51 = vmul.f32 %v651_v48, %v651_v48 }
 0x15f   : > { %v658_v52 = vpack.c.bf16 %v654_v50, %v651_v48  ;;  %v665_v53 = vadd.f32 %v654_v50, %v651_v48  ;;  %v676_v54 = vmul.f32 %v654_v50, %v654_v50 }
 0x161   : > { %663 = vst [vmem:[%s662_s15] sm:$0xff] %v658_v52  ;;  %v666_v55 = vrot.slane %v665_v53, 4  ;;  %v677_v56 = vadd.f32 %v676_v54, %v675_v51 }
 0x163   : > { %v667_v57 = vadd.f32 %v666_v55, %v665_v53  ;;  %v678_v58 = vrot.slane %v677_v56, 4 }
 0x165   : > { %v668_v59 = vrot.slane %v667_v57, 2  ;;  %v679_v60 = vadd.f32 %v678_v58, %v677_v56 }
 0x167   : > { %v669_v61 = vadd.f32 %v668_v59, %v667_v57  ;;  %v680_v62 = vrot.slane %v679_v60, 2 }
 0x169   : > { %v670_v63 = vrot.slane %v669_v61, 1  ;;  %v681_v0 = vadd.f32 %v680_v62, %v679_v60 }
 0x16b   : > { %v671_v2 = vadd.f32 %v670_v63, %v669_v61  ;;  %v682_v3 = vrot.slane %v681_v0, 1 }
 0x16d   : > { %v672_v5 = vadd.f32 %v671_v2, %v664_v1  ;;  %v683_v6 = vadd.f32 %v682_v3, %v681_v0 }
 0x16f   : > { %673 = vst [vmem:[#allocation3] sm:$0x1] %v672_v5  ;;  %v684_v7 = vadd.f32 %v683_v6, %v674_v4 }
 0x171   : > { %685 = vst [vmem:[#allocation4] sm:$0x1] %v684_v7 }
 0x172 PF: > { %p1114_p6 = scmp.ne.s32.totalorder %s1541_s5, 3 }
 0x173   : > { %v1480_v10 = vmov (!%p1114_p6), 0.0|0.0   ;;  %vm1481_vm0 = vmmov (!%p1114_p6), 0   ;;  %v1482_v14 = vmov (!%p1114_p6), 0.0   ;;  %v709_v17 = vlaneseq (!%p1114_p6)  ;;  %v696_v19 = vld [vmem:[%s1719_s2] sm:$0x1] (!%p1114_p6)  ;;  %v811_v21 = vld [vmem:[#allocation2 + $0x8] sm:$0xff] (!%p1114_p6) }
 0x174   : > { %689 = sbr.rel (%p1114_p6) target bundleno = 674 (0x2a2), region = 64  ;;  %1201 = vmatprep.subr.bf16.mxu0 (!%p1114_p6), %v1480_v10  ;;  %1204 = vmatprep.subr.bf16.mxu1 (!%p1114_p6), %v1480_v10  ;;  %v705_v20 = vld [vmem:[#allocation2] sm:$0xff] (!%p1114_p6)  ;;  %v903_v23 = vld [vmem:[#allocation2 + $0x10] sm:$0xff] (!%p1114_p6)  ;;  %v812_v28 = vunpack.c.l.bf16 (!%p1114_p6), %v811_v21  ;;  %v813_v30 = vunpack.c.h.bf16 (!%p1114_p6), %v811_v21  ;;  %s704_s23 = sld [smem:[#allocation5]] (!%p1114_p6)  ;;  %vm808_vm1 = vcmask (!%p1114_p6), 122880  }
 0x175   : > { %1184 = vmatprep.mubr.msk.f32.mxu0 (!%p1114_p6), %vm1481_vm0, %v1482_v14  ;;  %1191 = vmatprep.mubr.msk.f32.mxu1 (!%p1114_p6), %vm1481_vm0, %v1482_v14  ;;  %v710_v18 = vshrl.u32 (!%p1114_p6), %v709_v17, 7  ;;  %v706_v26 = vunpack.c.l.bf16 (!%p1114_p6), %v705_v20  ;;  %v707_v27 = vunpack.c.h.bf16 (!%p1114_p6), %v705_v20  ;;  %v700_v29 = vld [vmem:[%s1720_s3] sm:$0x1] (!%p1114_p6)  ;;  %v904_v31 = vunpack.c.l.bf16 (!%p1114_p6), %v903_v23 }
 0x176   : > { %v690_v8 = vld [vmem:[#allocation3] sm:$0x1] (!%p1114_p6)  ;;  %v905_v32 = vunpack.c.h.bf16 (!%p1114_p6), %v903_v23 }
 0x177   : > { %v691_v11 = vmul.f32 (!%p1114_p6), 0.025, %v690_v8  ;;  %v711_v22 = vsub.s32 (!%p1114_p6), 0, %v710_v18 }
 0x178   : > { %v692_v9 = vld [vmem:[#allocation4] sm:$0x1] (!%p1114_p6) }
 0x179   : > { %v693_v12 = vmul.f32 (!%p1114_p6), 0.025, %v692_v9  ;;  %v694_v13 = vmul.f32 (!%p1114_p6), %v691_v11, %v691_v11 }
 0x17b   : > { %v695_v15 = vsub.f32 %v693_v12, %v694_v13  ;;  %v703_v12 = vld [vmem:[%s1721_s4] sm:$0x1] }
 0x17d   : > { %v697_v16 = vadd.f32 1e-05, %v695_v15  ;;  %v736_v15 = vstv %s704_s23 }
 0x17f   : > { %1313 = vrsqrt.f32 %v697_v16 }
 0x189   : > { %v1314_v24 = vpop.eup %1313 }
 0x18a   : > { %v699_v25 = vmul.f32 %v1314_v24, %v696_v19 }
 0x18c   : > { %v701_v33 = vmul.f32 %v699_v25, %v691_v11  ;;  %v712_v34 = vrot.slane %v699_v25, %v711_v22 }
 0x18e   : > { %v702_v35 = vsub.f32 %v700_v29, %v701_v33  ;;  %v714_v36 = vmul.f32 %v712_v34, %v706_v26  ;;  %v715_v37 = vmul.f32 %v712_v34, %v707_v27  ;;  %v814_v38 = vmul.f32 %v812_v28, %v712_v34 }
 0x18f   : > { %v815_v39 = vmul.f32 %v813_v30, %v712_v34  ;;  %v906_v40 = vmul.f32 %v904_v31, %v712_v34  ;;  %v907_v41 = vmul.f32 %v905_v32, %v712_v34 }
 0x190   : > { %v720_v42 = vrot.slane %v702_v35, %v711_v22 }
 0x192   : > { %v722_v43 = vadd.f32 %v720_v42, %v714_v36  ;;  %v723_v44 = vadd.f32 %v720_v42, %v715_v37  ;;  %v816_v45 = vadd.f32 %v814_v38, %v720_v42  ;;  %v817_v46 = vadd.f32 %v815_v39, %v720_v42 }
 0x193   : > { %v908_v47 = vadd.f32 %v906_v40, %v720_v42  ;;  %v909_v48 = vadd.f32 %v907_v41, %v720_v42 }
 0x194   : > { %v1115_v49 = vmul.f32 -1.442695, %v722_v43  ;;  %v1116_v50 = vmul.f32 -1.442695, %v723_v44  ;;  %v1117_v51 = vmul.f32 -1.442695, %v816_v45 }
 0x195   : > { %v1118_v52 = vmul.f32 -1.442695, %v817_v46  ;;  %v1119_v53 = vmul.f32 -1.442695, %v908_v47  ;;  %v1120_v54 = vmul.f32 -1.442695, %v909_v48 }
 0x196   : > { %1315 = vpow2.f32 %v1115_v49 }
 0x197   : > { %1317 = vpow2.f32 %v1116_v50 }
 0x198   : > { %1319 = vpow2.f32 %v1117_v51 }
 0x199   : > { %1321 = vpow2.f32 %v1118_v52 }
 0x19a   : > { %1323 = vpow2.f32 %v1119_v53 }
 0x19b   : > { %1325 = vpow2.f32 %v1120_v54 }
 0x1a0   : > { %v1316_v55 = vpop.eup %1315 }
 0x1a1   : > { %v1318_v56 = vpop.eup %1317  ;;  %v730_v57 = vadd.f32 1.0, %v1316_v55 }
 0x1a2   : > { %v1320_v58 = vpop.eup %1319  ;;  %v731_v59 = vadd.f32 1.0, %v1318_v56 }
 0x1a3   : > { %v1322_v60 = vpop.eup %1321  ;;  %1327 = vrcp.f32 %v730_v57  ;;  %v824_v61 = vadd.f32 1.0, %v1320_v58 }
 0x1a4   : > { %v1324_v62 = vpop.eup %1323  ;;  %1329 = vrcp.f32 %v731_v59  ;;  %v825_v63 = vadd.f32 1.0, %v1322_v60 }
 0x1a5   : > { %v1326_v0 = vpop.eup %1325  ;;  %1331 = vrcp.f32 %v824_v61  ;;  %v916_v1 = vadd.f32 1.0, %v1324_v62 }
 0x1a6   : > { %1333 = vrcp.f32 %v825_v63  ;;  %v917_v2 = vadd.f32 1.0, %v1326_v0 }
 0x1a7   : > { %1335 = vrcp.f32 %v916_v1 }
 0x1a8   : > { %1337 = vrcp.f32 %v917_v2 }
 0x1ad   : > { %v1328_v3 = vpop.eup %1327 }
 0x1ae   : > { %v1330_v4 = vpop.eup %1329 }
 0x1af   : > { %v1332_v5 = vpop.eup %1331  ;;  %v1202_v6 = vpack.c.bf16 %v1330_v4, %v1328_v3 }
 0x1b0   : > { %v1334_v7 = vpop.eup %1333 }
 0x1b1   : > { %v1336_v8 = vpop.eup %1335  ;;  %1203 = vmatpush3.bf16.xpose.msra.mxu0 %v1202_v6  ;;  %v1205_v9 = vpack.c.bf16 %v1334_v7, %v1332_v5 }
 0x1b2   : > { %v1338_v11 = vpop.eup %1337  ;;  %1207 = vmatprep.subr.bf16.mxu0 %v1480_v10 }
 0x1b3   : > { %1206 = vmatpush3.bf16.xpose.msra.mxu1 %v1205_v9  ;;  %v1208_v13 = vpack.c.bf16 %v1338_v11, %v1336_v8 }
 0x1b8   : > { %1185 = vmatmul.mubr.f32.vlgmr.msra.gmra.mrb[0].mxu0 %v703_v12 }
 0x1b9   : > { %1209 = vmatpush3.bf16.xpose.msra.mxu0 %v1208_v13  ;;  %1198 = vmatprep.mubr.msk.f32.mxu0 %vm1481_vm0, %v1482_v14 }
 0x1ba   : > { %1192 = vmatmul.mubr.f32.vlgmr.msra.gmra.mrb[0].mxu1 %v703_v12 }
 0x1c0   : > { %1199 = vmatmul.mubr.f32.vlgmr.msra.gmra.mrb[2].mxu0 %v703_v12 }
 0x28b   : > { %v803_v16 = vpop.f32.mrb[0].mxu0 }
 0x28c   : > { %v804_v17 = vadd.f32 %v803_v16, %v736_v15  ;;  %v1186_v18 = vpop.f32.mrb[1].mxu0 }
 0x28d   : > { %v896_v19 = vpop.f32.mrb[0].mxu1 }
 0x28e   : > { %1339 = vtanh.f32 %v804_v17  ;;  %v897_v10 = vadd.f32 %v896_v19, %v736_v15  ;;  %v1193_v20 = vpop.f32.mrb[1].mxu1 }
 0x290   : > { %1341 = vtanh.f32 %v897_v10 }
 0x293   : > { %v988_v21 = vpop.f32.mrb[2].mxu0 }
 0x294   : > { %v989_v22 = vadd.f32 %v988_v21, %v736_v15  ;;  %v1200_v23 = vpop.f32.mrb[3].mxu0 }
 0x296   : > { %1343 = vtanh.f32 %v989_v22 }
 0x298   : > { %v1340_v24 = vpop.eup %1339 }
 0x299   : > { %809 = vst.msk [vmem:[#allocation11] sm:$0x1] %vm808_vm1, %v1340_v24 }
 0x29a   : > { %v1342_v14 = vpop.eup %1341 }
 0x29b   : > { %901 = vst.msk [vmem:[#allocation11 + $0x1] sm:$0x1] %vm808_vm1, %v1342_v14 }
 0x2a0   : > { %v1344_v25 = vpop.eup %1343 }
 0x2a1   : > { %993 = vst.msk [vmem:[#allocation11 + $0x2] sm:$0x1] %vm808_vm1, %v1344_v25 }
 0x2a2 PF: > { %p1231_p9 = scmp.eq.s32.totalorder %s1541_s5, 3  ;;  %s1483_s29 = smov [#allocation11]  }
 0x2a3   : > { %s1001_s9 = sshll.u32 %s1483_s29, 4  ;;  %s1002_s9 = int_to_ptr.vmem [resolvable:$true] %s1001_s9 }
 0x2a4   : > { %s1403_s11 = scalar_lea.vmem %s1002_s9, 64  ;;  %p1410_p0 = scmp.lt.s32.totalorder %s1002_s9, %s1002_s9 }
 0x2a5   : > { %p1404_p10 = scmp.ne.s32.totalorder %s1002_s9, %s1403_s11  ;;  %p1411_p3 = scmp.lt.s32.totalorder %s1403_s11, %s1403_s11 }
 0x2a7   : > { %p1405_p11 = pnand %p1404_p10, %p1231_p9  ;;  %p1412_p7 = por %p1411_p3, %p1410_p0 }
 0x2a9   : > { %p1406_p12 = pneg %p1405_p11 }
 0x2ab   : > { %p1413_p13 = pnand %p1412_p7, %p1406_p12 }
 0x2ad   : > { %1416 = shalt.err (!%p1413_p13)
}
 0x2ae   : > { %s1417_s13 = scalar_lea.hbm %s1723_s6, 64 }
 0x2af   : > { %p1418_p2 = scmp.ne.s32.totalorder %s1723_s6, %s1417_s13  ;;  %p1423_p4 = scmp.lt.u32.totalorder %s1417_s13, %s1723_s6 }
 0x2b1   : > { %p1419_p1 = pnand %p1418_p2, %p1231_p9 }
 0x2b3   : > { %p1420_p8 = pneg %p1419_p1 }
 0x2b5   : > { %p1425_p5 = pnand %p1423_p4, %p1420_p8 }
 0x2b7   : > { %1428 = shalt.err (!%p1425_p5)
}
 0x2b8   : > { %1217 = dma.vmem_to_hbm [thread:$0]  (%p1231_p9), %s1002_s9, 64, %s1723_s6, [#allocation8]  }
 0x2b9   : > { %1454 = dma.done.wait (%p1231_p9), [#allocation8], 64  }
 0x2ba   : > { %1456 = vsyncadd (%p1231_p9), [#allocation8], 4294967232 }
 0x2bb PF: > { %p19_p6 = scmp.ge.s32.totalorder %s1567_s8, 6   ;;  %s1738_s23 = smov %s1463_s24 }
 0x2bc   : > { %s1739_s24 = smov %s1467_s25  ;;  %s1740_s25 = smov %s1600_s10 }
 0x2bd   : > { %s1741_s26 = smov %s1567_s8  ;;  %21 = sbr.rel (!%p19_p6) target bundleno = 7 (0x7), region = 100 }
 0x2c4   :  { %1014 = vsyncpa [#allocation7], 1 }
 0x2c5   :  { %1016 = vsyncpa [#allocation7 + $0x1], 1 }
 0x2c6   :  { %1017 = vsyncpa [#allocation10], 1 }
 0x2c7   :  { %1018 = vsyncpa [#allocation8], 1 }
 0x2c8   :  { %1020 = vsyncpa [#allocation8 + $0x1], 1 }

</bundles_post_ra>
